<compile_context>
chip_gen: v7x
topology: tpu7x:2x2x1
jax: 0.10.0
libtpu: 0.0.40
codegen_flags: <defaults>
</compile_context>

<pallas_src>
import jax
import jax.numpy as jnp
from jax.experimental import pallas as pl
from jax.experimental.pallas import tpu as pltpu


def _cfg_channel_mix_kernel(x_ref, w_ref, add_ref, out_ref):
    # x_ref   : [B, C, Ts]   (Ts = spatial tile, lane-dense)
    # w_ref   : [C, C]       1x1-conv channel-mixing weights
    # add_ref : [B, C]  f32  bias + t*t_proj + Wc @ guided_emb (precomputed)
    # out_ref : [B, C, Ts]
    b = x_ref.shape[0]
    c = w_ref.shape[0]

    x = x_ref[...]                                   # [B, C, Ts]
    w_b = jnp.broadcast_to(w_ref[...], (b, c, c))    # tiny; hoisted once per step

    # Batched channel mix on the MXU: out[b, o, s] = sum_c W[o, c] * x[b, c, s]
    y = jnp.einsum(
        "boc,bcs->bos", w_b, x, preferred_element_type=jnp.float32
    )                                                # [B, C, Ts] f32 accumulate

    # Single broadcast add of the folded CFG / bias / timestep term (f32 on the
    # VPU; kept f32 even when matmul operands are bf16, for v5e compatibility).
    out_ref[...] = (y + add_ref[...][:, :, None]).astype(out_ref.dtype)


def _pick_spatial_tile(hw):
    """Lane-dense spatial tile: multiple of 128, big enough to amortize per-step
    overhead, but keep >= 2 grid steps when possible (v7x has 2 TensorCores)."""
    if hw % 128 != 0:
        # TODO(synk): non-multiple-of-128 spatial extent -> masked partial vst's
        return hw
    for t in (2048, 1024, 512, 256, 128):
        if hw % t == 0 and hw // t >= 2:
            return t
    return hw


def custom_noise_predictor(
    x, timestep, cond, uncond, cond_scale, params,
    *, matmul_dtype=jnp.float32, out_dtype=None,
):
    """x: [B, C, H, W] (NCHW), timestep: [B], cond/uncond: [B, Dc],
    cond_scale: python float, params: synthetic linear inner-model weights.

    matmul_dtype=jnp.bfloat16 halves x/W HBM bytes (recommended on v6e/v7x);
    accumulation and the elementwise tail stay f32."""
    B, C, H, W = x.shape
    HW = H * W
    if out_dtype is None:
        out_dtype = x.dtype

    # ---- tiny plain-JAX precompute (exact algebraic fold of the CFG combine;
    # ---- the inner model is linear in the conditioning embedding) -----------
    cs = jnp.asarray(cond_scale, dtype=jnp.float32)
    guided_emb = uncond.astype(jnp.float32) + cs * (
        cond.astype(jnp.float32) - uncond.astype(jnp.float32)
    )                                                           # [B, Dc]
    add_bc = (
        params["bias"][:, 0][None, :]
        + timestep.astype(jnp.float32)[:, None] * params["t_proj"][:, 0][None, :]
        + guided_emb @ params["Wc"].T
    ).astype(jnp.float32)                                       # [B, C]

    x_flat = x.reshape(B, C, HW).astype(matmul_dtype)
    w = params["W"].astype(matmul_dtype)

    tile_s = _pick_spatial_tile(HW)
    n_s = pl.cdiv(HW, tile_s)

    grid_spec = pltpu.PrefetchScalarGridSpec(
        num_scalar_prefetch=0,
        grid=(n_s,),
        in_specs=[
            pl.BlockSpec((B, C, tile_s), lambda s: (0, 0, s)),  # x (streamed)
            pl.BlockSpec((C, C), lambda s: (0, 0)),             # W (resident)
            pl.BlockSpec((B, C), lambda s: (0, 0)),             # folded add
        ],
        out_specs=pl.BlockSpec((B, C, tile_s), lambda s: (0, 0, s)),
    )

    out_flat = pl.pallas_call(
        _cfg_channel_mix_kernel,
        out_shape=jax.ShapeDtypeStruct((B, C, HW), out_dtype),
        grid_spec=grid_spec,
        compiler_params=pltpu.CompilerParams(
            dimension_semantics=("parallel",),   # spatial tiles shard across TCs
            vmem_limit_bytes=64 * 1024 * 1024,
        ),
    )(x_flat, w, add_bc)

    return out_flat.reshape(B, C, H, W)


def _reference(x, timestep, cond, uncond, cond_scale, params):
    """Un-folded reference: two model evals + CFG combine (matches PyTorch)."""
    B, C, H, W = x.shape
    xf = x.reshape(B, C, H * W)
    base = (
        jnp.einsum("oc,bcs->bos", params["W"], xf)
        + params["bias"][None]
        + timestep[:, None, None] * params["t_proj"][None]
    )
    c_proj = jnp.einsum("cd,bd->bc", params["Wc"], cond)[..., None]
    u_proj = jnp.einsum("cd,bd->bc", params["Wc"], uncond)[..., None]
    eps_c = base + c_proj
    eps_u = base + u_proj
    return (eps_u + cond_scale * (eps_c - eps_u)).reshape(B, C, H, W)


if __name__ == "__main__":
    B, C, H, W, Dc = 2, 4, 16, 16, 8
    key = jax.random.PRNGKey(0)
    k_x, k_c, k_u, k_w, k_b, k_tp, k_wc = jax.random.split(key, 7)

    x = jax.random.normal(k_x, (B, C, H, W), dtype=jnp.float32)
    timestep = jnp.array([999.0, 500.0], dtype=jnp.float32)
    cond = jax.random.normal(k_c, (B, Dc), dtype=jnp.float32)
    uncond = jax.random.normal(k_u, (B, Dc), dtype=jnp.float32)
    cond_scale = 7.5

    # deterministic synthetic inner-model parameters
    params = {
        "W": jax.random.normal(k_w, (C, C), dtype=jnp.float32) * 0.1,
        "bias": jax.random.normal(k_b, (C, 1), dtype=jnp.float32) * 0.01,
        "t_proj": jax.random.normal(k_tp, (C, 1), dtype=jnp.float32) * 1e-3,
        "Wc": jax.random.normal(k_wc, (C, Dc), dtype=jnp.float32) * 0.1,
    }

    ref = _reference(x, timestep, cond, uncond, cond_scale, params)

    # f32 path (tight tolerance)
    out = custom_noise_predictor(x, timestep, cond, uncond, cond_scale, params)
    out = jax.block_until_ready(out)
    assert out.shape == (B, C, H, W)
    assert jnp.allclose(out, ref, atol=1e-4, rtol=1e-4)

    # bf16 streamed-operand path (halves x/W HBM bytes on v6e/v7x); f32 accum.
    out_bf = custom_noise_predictor(
        x, timestep, cond, uncond, cond_scale, params,
        matmul_dtype=jnp.bfloat16,
    )
    out_bf = jax.block_until_ready(out_bf)
    assert jnp.allclose(out_bf.astype(jnp.float32), ref, atol=5e-2, rtol=5e-2)

    print("KERNEL_OK")
</pallas_src>

<mosaic_0001>
module attributes {stable_mosaic.version = 11 : i64} {
  func.func @_cfg_channel_mix_kernel(%arg0: i32, %arg1: memref<2x4x128xf32, #tpu.memory_space<vmem>>, %arg2: memref<4x4xf32, #tpu.memory_space<vmem>>, %arg3: memref<2x4xf32, #tpu.memory_space<vmem>>, %arg4: memref<2x4x128xf32, #tpu.memory_space<vmem>>) attributes {dimension_semantics = [#tpu.dimension_semantics<parallel>], iteration_bounds = array<i64: 2>, scalar_prefetch = 0 : i64, scratch_operands = 0 : i64, tpu.core_type = #tpu.core_type<tc>, window_params = [{transform_indices = @transform_0, window_bounds = array<i64: 2, 4, 128>}, {pipeline_mode = #tpu.pipeline_mode<synchronous>, transform_indices = @transform_1, window_bounds = array<i64: 4, 4>}, {pipeline_mode = #tpu.pipeline_mode<synchronous>, transform_indices = @transform_2, window_bounds = array<i64: 2, 4>}, {transform_indices = @transform_3, window_bounds = array<i64: 2, 4, 128>}]} {
    %c0 = arith.constant 0 : index
    %c0_0 = arith.constant 0 : index
    %c0_1 = arith.constant 0 : index
    %0 = vector.load %arg1[%c0, %c0_0, %c0_1] : memref<2x4x128xf32, #tpu.memory_space<vmem>>, vector<2x4x128xf32>
    %c0_2 = arith.constant 0 : index
    %c0_3 = arith.constant 0 : index
    %1 = vector.load %arg2[%c0_2, %c0_3] : memref<4x4xf32, #tpu.memory_space<vmem>>, vector<4x4xf32>
    %2 = vector.shape_cast %1 : vector<4x4xf32> to vector<1x4x4xf32>
    %3 = vector.broadcast %2 : vector<1x4x4xf32> to vector<2x4x4xf32>
    "tpu.trace_start"() <{level = 10 : i32, message = "boc,bcs->bos"}> : () -> ()
    %cst = arith.constant dense<0.000000e+00> : vector<2x4x128xf32>
    %4 = tpu.matmul %3, %0, %cst {dimension_numbers = #tpu.dot_dimension_numbers<[2], [1], [1], [2], [0, 0, 0, 1, 1, 2], [0], [0]>} : vector<2x4x4xf32>, vector<2x4x128xf32>, vector<2x4x128xf32> -> vector<2x4x128xf32>
    "tpu.trace_stop"() : () -> ()
    %c0_4 = arith.constant 0 : index
    %c0_5 = arith.constant 0 : index
    %5 = vector.load %arg3[%c0_4, %c0_5] : memref<2x4xf32, #tpu.memory_space<vmem>>, vector<2x4xf32>
    %6 = vector.shape_cast %5 : vector<2x4xf32> to vector<2x4x1xf32>
    %7 = vector.broadcast %6 : vector<2x4x1xf32> to vector<2x4x128xf32>
    %8 = arith.addf %4, %7 : vector<2x4x128xf32>
    %c0_6 = arith.constant 0 : index
    %c0_7 = arith.constant 0 : index
    %c0_8 = arith.constant 0 : index
    %9 = vector.load %arg4[%c0_6, %c0_7, %c0_8] : memref<2x4x128xf32, #tpu.memory_space<vmem>>, vector<2x4x128xf32>
    tpu.vector_store %arg4[%c0_6, %c0_7, %c0_8], %8 {strides = array<i32>} : memref<2x4x128xf32, #tpu.memory_space<vmem>>, vector<2x4x128xf32>,
    return
  }
  func.func @transform_0(%arg0: i32) -> (i32, i32, i32) {
    %c0_i32 = arith.constant 0 : i32
    %c0_i32_0 = arith.constant 0 : i32
    %c0_i32_1 = arith.constant 0 : i32
    return %c0_i32, %c0_i32_0, %arg0 : i32, i32, i32
  }
  func.func @transform_1(%arg0: i32) -> (i32, i32) {
    %c0_i32 = arith.constant 0 : i32
    %c0_i32_0 = arith.constant 0 : i32
    %c0_i32_1 = arith.constant 0 : i32
    return %c0_i32, %c0_i32_0 : i32, i32
  }
  func.func @transform_2(%arg0: i32) -> (i32, i32) {
    %c0_i32 = arith.constant 0 : i32
    %c0_i32_0 = arith.constant 0 : i32
    %c0_i32_1 = arith.constant 0 : i32
    return %c0_i32, %c0_i32_0 : i32, i32
  }
  func.func @transform_3(%arg0: i32) -> (i32, i32, i32) {
    %c0_i32 = arith.constant 0 : i32
    %c0_i32_0 = arith.constant 0 : i32
    %c0_i32_1 = arith.constant 0 : i32
    return %c0_i32, %c0_i32_0, %arg0 : i32, i32, i32
  }
}

</mosaic_0001>

<bundles_post_ra>
// kernel: tpu_custom_call.1
= control target key start
LH: loop header
LB: loop body
LE: loop exit
PB: predicated region body
PF: predicated region fallthrough
CT: control target
= control target key end

     0   :  { %8 = vsyncpa [#allocation3], 0  ;;  %s1023_s0 = inlined_call_operand.hbm [shape: f32[2,4,256], index: 0, kind: input, shape index: {}]   ;;  %s1024_s1 = inlined_call_operand.hbm [shape: f32[4,4], index: 1, kind: input, shape index: {}]   ;;  %s1025_s2 = inlined_call_operand.hbm [shape: f32[2,4], index: 2, kind: input, shape index: {}]   ;;  %s1026_s3 = inlined_call_operand.hbm [shape: f32[2,4,256], index: 3, kind: output, shape index: {}]  }
   0x1   :  { %10 = vsyncpa [#allocation3 + $0x1], 0 }
   0x2   :  { %11 = vsyncpa [#allocation6], 0 }
   0x3   :  { %12 = vsyncpa [#allocation4], 0 }
   0x4   :  { %14 = vsyncpa [#allocation4 + $0x1], 0  ;;  %s788_s12 = smov 0   ;;  %s790_s13 = smov 0  }
   0x5   :  { %s792_s14 = smov 0   ;;  %s794_s15 = smov 0  }
   0x6 LB: > { %s809_s16 = sadd.s32 4294967295, %s754_s15   ;;  %s489_s17 = sadd.s32 4294967294, %s754_s15   ;;  %s754_s15 = sphi %s794_s15, %s1051_s15   ;;  %s750_s14 = sphi %s792_s14, %s1050_s14   ;;  %s746_s13 = sphi %s790_s13, %s1049_s13   ;;  %s742_s12 = sphi %s788_s12, %s1048_s12  }
   0x7   : > { %s813_s18 = sadd.s32 1, %s754_s15   ;;  %s27_s19 = sadd.s32 1, %s750_s14 }
   0x8   : > { %s24_s20 = ssub.s32 %s754_s15, %s813_s18  ;;  %p34_p0 = scmp.ne.s32.totalorder %s750_s14, %s746_s13 }
   0x9   : > { %p25_p1 = scmp.eq.s32.totalorder %s24_s20, 0  ;;  %p35_p2 = scmp.eq.s32.totalorder %s754_s15, 0 }
   0xa   : > { %p40_p3 = scmp.ne.s32.totalorder %s746_s13, %s742_s12  ;;  %p1027_p4 = scmp.eq.s32.totalorder %s809_s16, 0 }
   0xb   : > { %s825_s21 = scalar_select %p25_p1, %s750_s14, %s27_s19  }
   0xc   : > { %p827_p5 = por %p35_p2, %p34_p0  ;;  %p833_p6 = por %p1027_p4, %p40_p3 }
   0xd   : > { %p106_p7 = scmp.eq.s32.totalorder %s809_s16, 1  ;;  %p112_p8 = scmp.eq.s32.totalorder %s489_s17, 1 }
   0xe   : > { %s1033_s23 = scalar_select %p833_p6, 1, 0 }
   0xf   : > { %p490_p9 = scmp.ge.s32.totalorder %s754_s15, 1  ;;  %p119_p10 = scmp.lt.s32.totalorder %s754_s15, 3 }
  0x10   : > { %p840_p11 = por %p106_p7, %p34_p0  ;;  %p844_p12 = por %p112_p8, %p40_p3 }
  0x11   : > { %p848_p13 = pnand %p490_p9, %p119_p10  ;;  %s756_s27 = smov [#allocation5]  }
  0x12   : > { %s1034_s24 = scalar_select %p840_p11, 1, 0 }
  0x13   : > { %s1035_s25 = scalar_select %p844_p12, 1, 0 }
  0x14   : > { %s1036_s26 = scalar_select %p848_p13, 1, 0 }
  0x15   : > { %p535_p2 = pneg %p848_p13  ;;  %s132_s28 = sshll.u32 %s756_s27, 4  ;;  %s133_s28 = int_to_ptr.vmem [resolvable:$true] %s132_s28 }
  0x16   : > { %p552_p4 = scmp.lt.s32.totalorder %s754_s15, 2  ;;  %p1037_p0 = scmp.eq.s32.totalorder %s809_s16, 0 }
  0x17   : > { %s757_s4 = smov [#allocation7]   ;;  %s598_s8 = scalar_lea.hbm %s1024_s1, 64 }
  0x18   : > { %p858_p7 = pnand %p535_p2, %p1037_p0  ;;  %p864_p3 = pnand %p552_p4, %p827_p5 }
  0x19   : > { %s143_s5 = sshll.u32 %s757_s4, 4  ;;  %p599_p8 = scmp.ne.s32.totalorder %s1024_s1, %s598_s8  ;;  %s868_s5 = int_to_ptr.vmem [resolvable:$true] %s143_s5 }
  0x1a   : > { %s1039_s30 = scalar_select %p864_p3, 1, 0 }
  0x1b   : > { %p600_p9 = pneg %p858_p7  ;;  %p605_p10 = scmp.lt.u32.totalorder %s598_s8, %s1024_s1 }
  0x1d   : > { %p601_p4 = pnand %p600_p9, %p599_p8 }
  0x1f   : > { %p602_p5 = pneg %p601_p4 }
  0x21   : > { %p607_p2 = pnand %p605_p10, %p602_p5 }
  0x23   : > { %610 = shalt.err (!%p607_p2)
}
  0x24   : > { %s611_s19 = scalar_lea.vmem %s133_s28, 64  ;;  %p619_p11 = scmp.lt.s32.totalorder %s133_s28, %s133_s28 }
  0x25   : > { %p612_p0 = scmp.ne.s32.totalorder %s133_s28, %s611_s19  ;;  %p620_p6 = scmp.lt.s32.totalorder %s611_s19, %s611_s19 }
  0x27   : > { %p614_p1 = pnand %p612_p0, %p600_p9  ;;  %p621_p13 = por %p620_p6, %p619_p11 }
  0x29   : > { %p615_p12 = pneg %p614_p1 }
  0x2b   : > { %p622_p3 = pnand %p621_p13, %p615_p12 }
  0x2d   : > { %625 = shalt.err (!%p622_p3)
}
  0x2e   : > { %538 = dma.hbm_to_vmem [thread:$0]  (!%p858_p7), %s1024_s1, 64, %s133_s28, [#allocation6]  }
  0x2f   : > { %s154_s27 = sand.u32 1, %s750_s14   ;;  %s626_s7 = scalar_lea.hbm %s1025_s2, 32 }
  0x30   : > { %p627_p1 = scmp.ne.s32.totalorder %s1025_s2, %s626_s7  ;;  %p633_p12 = scmp.lt.u32.totalorder %s626_s7, %s1025_s2 }
  0x32   : > { %p629_p6 = pnand %p627_p1, %p600_p9 }
  0x34   : > { %p630_p11 = pneg %p629_p6 }
  0x36   : > { %p635_p13 = pnand %p633_p12, %p630_p11 }
  0x38   : > { %638 = shalt.err (!%p635_p13)
}
  0x39   : > { %s639_s28 = scalar_lea.vmem %s868_s5, 32  ;;  %p647_p5 = scmp.lt.s32.totalorder %s868_s5, %s868_s5 }
  0x3a   : > { %p640_p3 = scmp.ne.s32.totalorder %s868_s5, %s639_s28  ;;  %p648_p10 = scmp.lt.s32.totalorder %s639_s28, %s639_s28 }
  0x3c   : > { %p642_p8 = pnand %p640_p3, %p600_p9  ;;  %p649_p2 = por %p648_p10, %p647_p5 }
  0x3e   : > { %p643_p4 = pneg %p642_p8 }
  0x40   : > { %p650_p0 = pnand %p649_p2, %p643_p4 }
  0x42   : > { %653 = shalt.err (!%p650_p0)
}
  0x43   : > { %541 = dma.hbm_to_vmem [thread:$0]  (!%p858_p7), %s1025_s2, 32, %s868_s5, [#allocation6]  }
  0x44   : > { %s494_s20 = sshll.u32 %s154_s27, 3  ;;  %s495_s22 = sshll.u32 %s754_s15, 6 }
  0x45   : > { %s922_s7 = scalar_lea.hbm %s1023_s0, %s495_s22  ;;  %s158_s29 = scalar_lea.vmem [#allocation2], %s494_s20 }
  0x46   : > { %s164_s8 = sshll.u32 %s158_s29, 4  ;;  %s926_s9 = scalar_lea.sflag [#allocation3], %s154_s27  ;;  %s924_s8 = int_to_ptr.vmem [resolvable:$true] %s164_s8 }
  0x47   : > { %s654_s10 = scalar_lea.hbm %s922_s7, 128  ;;  %p1040_p7 = scmp.ne.s32.totalorder %s1039_s30, 0 }
  0x48   : > { %p655_p9 = scmp.ne.s32.totalorder %s922_s7, %s654_s10  ;;  %s659_s28 = scalar_lea.hbm %s1023_s0, 256 }
  0x49   : > { %p656_p1 = pneg %p1040_p7  ;;  %p660_p12 = scmp.lt.u32.totalorder %s922_s7, %s1023_s0 }
  0x4a   : > { %p661_p13 = scmp.lt.u32.totalorder %s659_s28, %s654_s10  ;;  %p663_p8 = scmp.lt.u32.totalorder %s654_s10, %s922_s7 }
  0x4b   : > { %p657_p6 = pnand %p656_p1, %p655_p9 }
  0x4c   : > { %p662_p3 = por %p661_p13, %p660_p12 }
  0x4d   : > { %p658_p11 = pneg %p657_p6 }
  0x4e   : > { %p664_p4 = por %p663_p8, %p662_p3 }
  0x50   : > { %p665_p5 = pnand %p664_p4, %p658_p11 }
  0x52   : > { %668 = shalt.err (!%p665_p5)
}
  0x53   : > { %s669_s27 = scalar_lea.vmem %s924_s8, 128  ;;  %s758_s20 = smov [#allocation2]  }
  0x54   : > { %p670_p10 = scmp.ne.s32.totalorder %s924_s8, %s669_s27  ;;  %s674_s22 = sshll.u32 %s758_s20, 4  ;;  %s675_s22 = int_to_ptr.vmem [resolvable:$false] %s674_s22 }
  0x55   : > { %s676_s4 = scalar_lea.vmem %s675_s22, 256  ;;  %p677_p9 = scmp.lt.s32.totalorder %s924_s8, %s675_s22 }
  0x56   : > { %p672_p2 = pnand %p670_p10, %p656_p1  ;;  %p678_p6 = scmp.lt.s32.totalorder %s676_s4, %s669_s27 }
  0x58   : > { %p673_p0 = pneg %p672_p2  ;;  %p679_p12 = por %p678_p6, %p677_p9 }
  0x5a   : > { %p680_p13 = pnand %p679_p12, %p673_p0 }
  0x5c   : > { %683 = shalt.err (!%p680_p13)
}
  0x5d   : > { %s759_s6 = smov 128   ;;  %s760_s29 = smov 64  }
  0x5e   : > { %s761_s10 = smov 4   ;;  %p1041_p1 = scmp.ne.s32.totalorder %s1036_s26, 0 }
  0x5f   : > { %545 = dma.hbm_to_vmem [thread:$0]  (!%p1040_p7), %s922_s7, 128, %s924_s8, %s926_s9, %s759_s6, %s760_s29, %s761_s10  }
  0x60   : > { %176 = sbr.rel (%p1041_p1) target bundleno = 341 (0x155), region = 32  ;;  %s957_s5 = sand.u32 (!%p1041_p1), 1, %s746_s13  }
  0x61   : > { %s497_s11 = sshll.u32 (!%p1041_p1), %s957_s5, 3  ;;  %s179_s28 = scalar_lea.sflag (!%p1041_p1), [#allocation3], %s957_s5 }
  0x62   : > { %s182_s17 = scalar_lea.vmem (!%p1041_p1), [#allocation2], %s497_s11  ;;  %p1042_p11 = scmp.ne.s32.totalorder (!%p1041_p1), %s1033_s23, 0 }
  0x67   : > { %729 = dma.done.wait (%p1042_p11), %s179_s28, 128  }
  0x68   : > { %731 = vsyncadd (%p1042_p11), %s179_s28, 4294967168  ;;  %p1043_p7 = scmp.eq.s32.totalorder %s809_s16, 0 }
  0x6a   : > { %733 = dma.done.wait (%p1043_p7), [#allocation6], 96   ;;  %p1044_p3 = pmov %p1043_p7 }
  0x6b   : > { %v762_v0 = vmov 0.0   ;;  %v217_v1 = vlaneseq  ;;  %vm763_vm0 = vmmov 0   ;;  %vm235_vm1 = vcmask 1043456   ;;  %v213_v5 = vld [vmem:[%s182_s17] sm:$0xf]  ;;  %s212_s23 = scalar_lea.vmem [#allocation8], %s497_s11 }
  0x6c   : > { %735 = vsyncadd (%p1044_p3), [#allocation6], 4294967200  ;;  %513 = vmatprep.subr.mxu0 %v762_v0  ;;  %518 = vmatprep.subr.mxu1 %v762_v0  ;;  %vm231_vm2 = vcmask 31744   ;;  %v214_v6 = vld [vmem:[%s182_s17 + $0x4] sm:$0xf]  ;;  %s397_s26 = sshll.u32 %s212_s23, 4  ;;  %s974_s26 = int_to_ptr.vmem [resolvable:$true] %s397_s26 }
  0x6d   : > { %515 = vmatprep.mubr.msk.f32.mxu0 %vm763_vm0, %v762_v0  ;;  %520 = vmatprep.mubr.msk.f32.mxu1 %vm763_vm0, %v762_v0  ;;  %v218_v2 = vshrl.u32 %v217_v1, 7  ;;  %v215_v7 = vld [vmem:[#allocation5] sm:$0xf]  ;;  %v216_v8 = vld [vmem:[#allocation7] sm:$0x3]  ;;  %s506_s30 = sshll.u32 %s809_s16, 6 }
  0x6e   : > { %514 = vmatpush3.msk.msra.mxu0 %vm235_vm1, %v213_v5  ;;  %519 = vmatpush3.msk.msra.mxu1 %vm235_vm1, %v214_v6  ;;  %s979_s9 = scalar_lea.hbm %s1026_s3, %s506_s30  ;;  %s385_s16 = scalar_lea.sflag [#allocation4], %s957_s5 }
  0x6f   : > { %v219_v3 = vsub.s32 0, %v218_v2  ;;  %v226_v4 = vsub.s32 1, %v218_v2  ;;  %516 = vmatmul.mubr.msk.f32.vlgmr.msra.gmra.mrb[0].mxu0 %vm231_vm2, %v215_v7  ;;  %521 = vmatmul.mubr.msk.f32.vlgmr.msra.gmra.mrb[0].mxu1 %vm231_vm2, %v215_v7  ;;  %s684_s19 = scalar_lea.vmem %s974_s26, 128  ;;  %p1045_p4 = scmp.ne.s32.totalorder %s1034_s24, 0 }
  0x70   : > { %p685_p8 = scmp.ne.s32.totalorder %s974_s26, %s684_s19  ;;  %s764_s27 = smov [#allocation8]  }
  0x71   : > { %v220_v9 = vrot.slane %v216_v8, %v219_v3  ;;  %v227_v10 = vrot.slane %v216_v8, %v226_v4  ;;  %s688_s20 = sshll.u32 %s764_s27, 4  ;;  %s689_s20 = int_to_ptr.vmem [resolvable:$false] %s688_s20 }
  0x72   : > { %p686_p5 = pnand %p685_p8, %p1045_p4  ;;  %s690_s22 = scalar_lea.vmem %s689_s20, 256 }
  0x73   : > { %222 = vbcast.lane.b32.xlu0 %v220_v9, 256  ;;  %p691_p2 = scmp.lt.s32.totalorder %s974_s26, %s689_s20  ;;  %p692_p0 = scmp.lt.s32.totalorder %s690_s22, %s684_s19 }
  0x74   : > { %p687_p10 = pneg %p686_p5 }
  0x75   : > { %p693_p9 = por %p692_p0, %p691_p2 }
  0x77   : > { %229 = vbcast.lane.b32.xlu0 %v227_v10, 256  ;;  %p694_p6 = pnand %p693_p9, %p687_p10 }
  0xe5   : > { %v223_v11 = vpop.permute.xlu0 %222 }
  0xe9   : > { %v230_v12 = vpop.permute.xlu0 %229 }
 0x142   : > { %v305_v13 = vpop.f32.mrb[0].mxu0  ;;  %v378_v14 = vpop.f32.mrb[0].mxu1 }
 0x143   : > { %v306_v15 = vadd.f32 %v305_v13, %v223_v11  ;;  %v379_v16 = vadd.f32 %v378_v14, %v230_v12  ;;  %v517_v17 = vpop.f32.mrb[1].mxu0  ;;  %v522_v18 = vpop.f32.mrb[1].mxu1 }
 0x145   : > { %382 = vst [vmem:[%s212_s23] sm:$0xf] %v306_v15  ;;  %383 = vst [vmem:[%s212_s23 + $0x4] sm:$0xf] %v379_v16 }
 0x146   : > { %697 = shalt.err (!%p694_p6)
}
 0x147   : > { %s698_s4 = scalar_lea.hbm %s979_s9, 128  ;;  %s702_s10 = scalar_lea.hbm %s1026_s3, 256 }
 0x148   : > { %p699_p12 = scmp.ne.s32.totalorder %s979_s9, %s698_s4  ;;  %p703_p11 = scmp.lt.u32.totalorder %s979_s9, %s1026_s3 }
 0x149   : > { %p704_p7 = scmp.lt.u32.totalorder %s702_s10, %s698_s4  ;;  %p706_p8 = scmp.lt.u32.totalorder %s698_s4, %s979_s9 }
 0x14a   : > { %p700_p13 = pnand %p699_p12, %p1045_p4 }
 0x14b   : > { %p705_p3 = por %p704_p7, %p703_p11 }
 0x14c   : > { %p701_p1 = pneg %p700_p13 }
 0x14d   : > { %p707_p5 = por %p706_p8, %p705_p3 }
 0x14f   : > { %p708_p10 = pnand %p707_p5, %p701_p1 }
 0x151   : > { %711 = shalt.err (!%p708_p10)
}
 0x152   : > { %s765_s17 = smov 64   ;;  %s766_s23 = smov 128  }
 0x153   : > { %s767_s30 = smov 4  }
 0x154   : > { %533 = dma.vmem_to_hbm [thread:$0]  (%p1045_p4), %s974_s26, 128, %s979_s9, %s385_s16, %s765_s17, %s766_s23, %s767_s30  }
 0x155 PF: > { %s412_s7 = sand.u32 1, %s742_s12   ;;  %p1046_p2 = scmp.ne.s32.totalorder %s1035_s25, 0 }
 0x156   : > { %p1047_p0 = scmp.ge.s32.totalorder %s754_s15, 2  ;;  %s413_s8 = scalar_lea.sflag [#allocation4], %s412_s7 }
 0x158   : > { %p547_p9 = pnand %p1047_p0, %p1046_p2 }
 0x15a   : > { %737 = dma.done.wait (!%p547_p9), %s413_s8, 128  }
 0x15b   : > { %739 = vsyncadd (!%p547_p9), %s413_s8, 4294967168  ;;  %p17_p6 = scmp.ge.s32.totalorder %s813_s18, 4   ;;  %s1048_s12 = smov %s746_s13 }
 0x15c   : > { %s1049_s13 = smov %s750_s14  ;;  %s1050_s14 = smov %s825_s21 }
 0x15d   : > { %s1051_s15 = smov %s813_s18  ;;  %19 = sbr.rel (!%p17_p6) target bundleno = 6 (0x6), region = 85 }
 0x164   :  { %418 = vsyncpa [#allocation3], 1 }
 0x165   :  { %420 = vsyncpa [#allocation3 + $0x1], 1 }
 0x166   :  { %421 = vsyncpa [#allocation6], 1 }
 0x167   :  { %422 = vsyncpa [#allocation4], 1 }
 0x168   :  { %424 = vsyncpa [#allocation4 + $0x1], 1 }

</bundles_post_ra>
